<compile_context>
chip_gen: v7x
topology: tpu7x:2x2x1
jax: 0.10.0
libtpu: 0.0.40
codegen_flags: <defaults>
</compile_context>

<pallas_src>
import functools

import jax
import jax.numpy as jnp
import numpy as np
from jax.experimental import pallas as pl
from jax.experimental.pallas import tpu as pltpu

_LANES = 128
_SUBLANES = 8


def _rectify_kernel(mats_ref, pt_ref, ps_ref, o1_ref, o2_ref, os_ref,
                    *, eps, su, sv):
    # mats_ref : SMEM (B, 36)   per batch: [M1 (3,4), M2 (3,4), K3 (3,4)]
    # pt_ref   : VMEM (1, 4, S, 128)   points_t channels (x, y, z, w)
    # ps_ref   : VMEM (1, 4, S, 128)   points_s channels
    # o*_ref   : VMEM (1, 2, S, 128)
    b = pl.program_id(0)

    pt = pt_ref[0].astype(jnp.float32)   # (4, S, 128) -- leading-dim slices are free
    ps = ps_ref[0].astype(jnp.float32)

    def apply3x4(base, p):
        # 3x4 scalar-broadcast matrix apply on dense (S, 128) slabs.
        rows = []
        for r in range(3):
            acc = mats_ref[b, base + 4 * r + 0] * p[0]
            for k in range(1, 4):
                acc = acc + mats_ref[b, base + 4 * r + k] * p[k]
            rows.append(acc)
        return rows

    cam_s = apply3x4(24, ps)          # K[:, :3, :] @ points_s
    d1 = apply3x4(0, pt)              # (K3 - (K@res1_T)[:3]) @ points_t
    d2 = apply3x4(12, pt)             # (K3 - (K@res2_T)[:3]) @ points_t

    # rec{1,2}_cam_points = cam_t + (cam_s - cam_res{1,2}) = d{1,2} + cam_s
    rec1 = [d1[i] + cam_s[i] for i in range(3)]
    rec2 = [d2[i] + cam_s[i] for i in range(3)]

    def recip(x):
        # EUP approx reciprocal + one Newton-Raphson step: ~f32 accuracy,
        # avoids the multi-op VALU divide sequence.
        r = pl.reciprocal(x, approx=True)
        return r * (2.0 - x * r)

    inv1 = recip(rec1[2] + eps)
    inv2 = recip(rec2[2] + eps)
    invs = recip(cam_s[2] + eps)

    dt = o1_ref.dtype
    o1_ref[0, 0] = (rec1[0] * inv1).astype(dt)
    o1_ref[0, 1] = (rec1[1] * inv1).astype(dt)
    o2_ref[0, 0] = (rec2[0] * inv2).astype(dt)
    o2_ref[0, 1] = (rec2[1] * inv2).astype(dt)
    # (x/(z+eps)/(W-1) - 0.5)*2  ==  x*inv * (2/(W-1)) - 1
    os_ref[0, 0] = (cam_s[0] * invs * su - 1.0).astype(dt)
    os_ref[0, 1] = (cam_s[1] * invs * sv - 1.0).astype(dt)


def _pick_rows(q, batch, *, max_rows=512, min_steps=8):
    """Largest multiple-of-8 divisor of q (<= max_rows, i.e. <= 64K pixels per
    step) that still leaves >= min_steps total grid steps for pipelining /
    megacore sharding; relaxes gracefully for tiny problems."""
    divisors = [s for s in range(_SUBLANES, min(q, max_rows) + 1, _SUBLANES)
                if q % s == 0]
    if not divisors:
        return q
    for thresh in (min_steps, 2, 1):
        for s in reversed(divisors):
            if batch * (q // s) >= thresh:
                return s
    return divisors[0]


def rectify_pixel(points_t, points_s, K, res1_T, res2_T,
                  *, batch_size, height, width, eps=1e-7):
    """Forward pass of Rectify_Pixel.

    points_t, points_s : (B, 4, H*W) homogeneous camera points
    K, res1_T, res2_T  : (B, 4, 4)
    returns            : (rec1_pix, rec2_pix, pix_s), each (B, H, W, 2)
    """
    B, four, HW = points_t.shape
    assert four == 4 and HW == height * width and B == batch_size
    out_dtype = points_t.dtype

    # Tiny (B,4,4) matmuls + the K3 - P fold: cheaper in the wrapper than
    # re-deriving per tile.  Kernel only needs the three (3,4) matrices.
    Kf = K.astype(jnp.float32)
    K3 = Kf[:, :3, :]
    M1 = K3 - jnp.matmul(Kf, res1_T.astype(jnp.float32))[:, :3, :]
    M2 = K3 - jnp.matmul(Kf, res2_T.astype(jnp.float32))[:, :3, :]
    mats = jnp.stack([M1, M2, K3], axis=1).reshape(B, 36)

    # Pad the pixel axis up to a multiple of 8*128 so blocks are always
    # (multiple-of-8, 128) lane/sublane-dense tiles (no full-HW fallback).
    unit = _SUBLANES * _LANES
    hwp = ((HW + unit - 1) // unit) * unit
    if hwp != HW:
        pad = ((0, 0), (0, 0), (0, hwp - HW))
        points_t = jnp.pad(points_t, pad)
        points_s = jnp.pad(points_s, pad)
    q = hwp // _LANES
    pt4 = points_t.reshape(B, 4, q, _LANES)
    ps4 = points_s.reshape(B, 4, q, _LANES)

    rows = _pick_rows(q, B)
    grid = (B, q // rows)

    kernel = functools.partial(
        _rectify_kernel, eps=float(eps),
        su=2.0 / float(width - 1), sv=2.0 / float(height - 1))

    out_sds = jax.ShapeDtypeStruct((B, 2, q, _LANES), out_dtype)
    in_spec = pl.BlockSpec((1, 4, rows, _LANES), lambda b, t: (b, 0, t, 0))
    out_spec = pl.BlockSpec((1, 2, rows, _LANES), lambda b, t: (b, 0, t, 0))

    o1, o2, os_ = pl.pallas_call(
        kernel,
        out_shape=(out_sds, out_sds, out_sds),
        grid_spec=pltpu.PrefetchScalarGridSpec(
            num_scalar_prefetch=0,
            grid=grid,
            in_specs=[
                pl.BlockSpec(memory_space=pltpu.MemorySpace.SMEM),  # mats (B,36)
                in_spec,                                            # points_t
                in_spec,                                            # points_s
            ],
            out_specs=[out_spec, out_spec, out_spec],
        ),
        compiler_params=pltpu.CompilerParams(
            dimension_semantics=("parallel", "parallel"),
            vmem_limit_bytes=32 * 1024 * 1024),
    )(mats, pt4, ps4)

    def to_pix(o):
        o = o.reshape(B, 2, hwp)[:, :, :HW].reshape(B, 2, height, width)
        # TODO(synk): this channel-last permute is one extra XLA pass over the
        # small 2-channel outputs; fusing it into the kernel would need a
        # 128->256 lane perfect-shuffle that Mosaic has no cheap primitive for.
        return jnp.transpose(o, (0, 2, 3, 1))

    return to_pix(o1), to_pix(o2), to_pix(os_)


def _reference(points_t, points_s, K, res1_T, res2_T, batch_size, height, width,
               eps=1e-7):
    # Pure-JAX mirror of the PyTorch forward.
    P1 = jnp.matmul(K, res1_T)[:, :3, :]
    P2 = jnp.matmul(K, res2_T)[:, :3, :]
    cam_res1 = jnp.matmul(P1, points_t)
    cam_res2 = jnp.matmul(P2, points_t)
    cam_s = jnp.matmul(K[:, :3, :], points_s)
    cam_t = jnp.matmul(K[:, :3, :], points_t)
    rec1 = cam_t + (cam_s - cam_res1)
    rec2 = cam_t + (cam_s - cam_res2)

    def pix(c):
        p = c[:, :2, :] / (c[:, 2:3, :] + eps)
        p = p.reshape(batch_size, 2, height, width)
        return jnp.transpose(p, (0, 2, 3, 1))

    r1 = pix(rec1)
    r2 = pix(rec2)
    ps_pix = pix(cam_s)
    ps_pix = ps_pix.at[..., 0].divide(width - 1)
    ps_pix = ps_pix.at[..., 1].divide(height - 1)
    ps_pix = (ps_pix - 0.5) * 2.0
    return r1, r2, ps_pix


if __name__ == "__main__":
    key = jax.random.PRNGKey(0)
    k1, k2, k3, k4 = jax.random.split(key, 4)

    B, H, W = 2, 16, 16
    HW = H * W

    # Homogeneous 3D points (x, y, z, 1) with z in [1, 3] so perspective
    # denominators stay well away from zero.
    def make_points(k):
        ka, kb = jax.random.split(k)
        xy = jax.random.normal(ka, (B, 2, HW), dtype=jnp.float32)
        z = jax.random.uniform(kb, (B, 1, HW), dtype=jnp.float32,
                               minval=1.0, maxval=3.0)
        ones = jnp.ones((B, 1, HW), dtype=jnp.float32)
        return jnp.concatenate([xy, z, ones], axis=1)

    points_t = make_points(k1)
    points_s = make_points(k2)

    # Pinhole intrinsics (4x4), broadcast over the batch.
    K = jnp.array([[10.0, 0.0, W / 2.0, 0.0],
                   [0.0, 10.0, H / 2.0, 0.0],
                   [0.0, 0.0, 1.0, 0.0],
                   [0.0, 0.0, 0.0, 1.0]], dtype=jnp.float32)
    K = jnp.broadcast_to(K, (B, 4, 4))

    # Small perturbations of identity for the residual transforms.
    def make_T(k):
        ka, kb = jax.random.split(k)
        rot = (jnp.eye(3, dtype=jnp.float32)
               + 0.02 * jax.random.normal(ka, (B, 3, 3), dtype=jnp.float32))
        trans = 0.1 * jax.random.normal(kb, (B, 3, 1), dtype=jnp.float32)
        top = jnp.concatenate([rot, trans], axis=2)                   # (B, 3, 4)
        bottom = jnp.broadcast_to(
            jnp.array([[0.0, 0.0, 0.0, 1.0]], jnp.float32), (B, 1, 4))
        return jnp.concatenate([top, bottom], axis=1)                 # (B, 4, 4)

    res1_T = make_T(k3)
    res2_T = make_T(k4)

    outs = rectify_pixel(points_t, points_s, K, res1_T, res2_T,
                         batch_size=B, height=H, width=W)
    outs = jax.block_until_ready(outs)

    refs = jax.block_until_ready(
        _reference(points_t, points_s, K, res1_T, res2_T, B, H, W))

    for o, r in zip(outs, refs):
        assert o.shape == (B, H, W, 2)
        assert np.allclose(np.asarray(o), np.asarray(r), atol=1e-4, rtol=1e-4), \
            float(np.max(np.abs(np.asarray(o) - np.asarray(r))))

    print("KERNEL_OK")
</pallas_src>

<mosaic_0001>
module attributes {stable_mosaic.version = 11 : i64} {
  func.func @_rectify_kernel(%arg0: i32, %arg1: i32, %arg2: memref<2x36xf32, #tpu.memory_space<smem>>, %arg3: memref<1x4x8x128xf32, #tpu.memory_space<vmem>>, %arg4: memref<1x4x8x128xf32, #tpu.memory_space<vmem>>, %arg5: memref<1x2x8x128xf32, #tpu.memory_space<vmem>>, %arg6: memref<1x2x8x128xf32, #tpu.memory_space<vmem>>, %arg7: memref<1x2x8x128xf32, #tpu.memory_space<vmem>>) attributes {dimension_semantics = [#tpu.dimension_semantics<parallel>, #tpu.dimension_semantics<parallel>], iteration_bounds = array<i64: 2, 1>, scalar_prefetch = 0 : i64, scratch_operands = 0 : i64, tpu.core_type = #tpu.core_type<tc>, window_params = [{transform_indices = @transform_0, window_bounds = array<i64: 2, 36>}, {transform_indices = @transform_1, window_bounds = array<i64: 1, 4, 8, 128>}, {transform_indices = @transform_2, window_bounds = array<i64: 1, 4, 8, 128>}, {transform_indices = @transform_3, window_bounds = array<i64: 1, 2, 8, 128>}, {transform_indices = @transform_4, window_bounds = array<i64: 1, 2, 8, 128>}, {transform_indices = @transform_5, window_bounds = array<i64: 1, 2, 8, 128>}]} {
    %c0 = arith.constant 0 : index
    %c0_0 = arith.constant 0 : index
    %c0_1 = arith.constant 0 : index
    %c0_2 = arith.constant 0 : index
    %0 = vector.load %arg3[%c0, %c0_0, %c0_1, %c0_2] : memref<1x4x8x128xf32, #tpu.memory_space<vmem>>, vector<1x4x8x128xf32>
    %1 = vector.shape_cast %0 : vector<1x4x8x128xf32> to vector<4x8x128xf32>
    %c0_3 = arith.constant 0 : index
    %c0_4 = arith.constant 0 : index
    %c0_5 = arith.constant 0 : index
    %c0_6 = arith.constant 0 : index
    %2 = vector.load %arg4[%c0_3, %c0_4, %c0_5, %c0_6] : memref<1x4x8x128xf32, #tpu.memory_space<vmem>>, vector<1x4x8x128xf32>
    %3 = vector.shape_cast %2 : vector<1x4x8x128xf32> to vector<4x8x128xf32>
    %4 = arith.index_cast %arg0 : i32 to index
    %c24 = arith.constant 24 : index
    %5 = memref.load %arg2[%4, %c24] : memref<2x36xf32, #tpu.memory_space<smem>>
    %6 = vector.extract_strided_slice %3 {offsets = [0, 0, 0], sizes = [1, 8, 128], strides = [1, 1, 1]} : vector<4x8x128xf32> to vector<1x8x128xf32>
    %7 = vector.shape_cast %6 : vector<1x8x128xf32> to vector<8x128xf32>
    %8 = vector.broadcast %5 : f32 to vector<8x128xf32>
    %9 = arith.mulf %8, %7 : vector<8x128xf32>
    %10 = arith.index_cast %arg0 : i32 to index
    %c25 = arith.constant 25 : index
    %11 = memref.load %arg2[%10, %c25] : memref<2x36xf32, #tpu.memory_space<smem>>
    %12 = vector.extract_strided_slice %3 {offsets = [1, 0, 0], sizes = [1, 8, 128], strides = [1, 1, 1]} : vector<4x8x128xf32> to vector<1x8x128xf32>
    %13 = vector.shape_cast %12 : vector<1x8x128xf32> to vector<8x128xf32>
    %14 = vector.broadcast %11 : f32 to vector<8x128xf32>
    %15 = arith.mulf %14, %13 : vector<8x128xf32>
    %16 = arith.addf %9, %15 : vector<8x128xf32>
    %17 = arith.index_cast %arg0 : i32 to index
    %c26 = arith.constant 26 : index
    %18 = memref.load %arg2[%17, %c26] : memref<2x36xf32, #tpu.memory_space<smem>>
    %19 = vector.extract_strided_slice %3 {offsets = [2, 0, 0], sizes = [1, 8, 128], strides = [1, 1, 1]} : vector<4x8x128xf32> to vector<1x8x128xf32>
    %20 = vector.shape_cast %19 : vector<1x8x128xf32> to vector<8x128xf32>
    %21 = vector.broadcast %18 : f32 to vector<8x128xf32>
    %22 = arith.mulf %21, %20 : vector<8x128xf32>
    %23 = arith.addf %16, %22 : vector<8x128xf32>
    %24 = arith.index_cast %arg0 : i32 to index
    %c27 = arith.constant 27 : index
    %25 = memref.load %arg2[%24, %c27] : memref<2x36xf32, #tpu.memory_space<smem>>
    %26 = vector.extract_strided_slice %3 {offsets = [3, 0, 0], sizes = [1, 8, 128], strides = [1, 1, 1]} : vector<4x8x128xf32> to vector<1x8x128xf32>
    %27 = vector.shape_cast %26 : vector<1x8x128xf32> to vector<8x128xf32>
    %28 = vector.broadcast %25 : f32 to vector<8x128xf32>
    %29 = arith.mulf %28, %27 : vector<8x128xf32>
    %30 = arith.addf %23, %29 : vector<8x128xf32>
    %31 = arith.index_cast %arg0 : i32 to index
    %c28 = arith.constant 28 : index
    %32 = memref.load %arg2[%31, %c28] : memref<2x36xf32, #tpu.memory_space<smem>>
    %33 = vector.extract_strided_slice %3 {offsets = [0, 0, 0], sizes = [1, 8, 128], strides = [1, 1, 1]} : vector<4x8x128xf32> to vector<1x8x128xf32>
    %34 = vector.shape_cast %33 : vector<1x8x128xf32> to vector<8x128xf32>
    %35 = vector.broadcast %32 : f32 to vector<8x128xf32>
    %36 = arith.mulf %35, %34 : vector<8x128xf32>
    %37 = arith.index_cast %arg0 : i32 to index
    %c29 = arith.constant 29 : index
    %38 = memref.load %arg2[%37, %c29] : memref<2x36xf32, #tpu.memory_space<smem>>
    %39 = vector.extract_strided_slice %3 {offsets = [1, 0, 0], sizes = [1, 8, 128], strides = [1, 1, 1]} : vector<4x8x128xf32> to vector<1x8x128xf32>
    %40 = vector.shape_cast %39 : vector<1x8x128xf32> to vector<8x128xf32>
    %41 = vector.broadcast %38 : f32 to vector<8x128xf32>
    %42 = arith.mulf %41, %40 : vector<8x128xf32>
    %43 = arith.addf %36, %42 : vector<8x128xf32>
    %44 = arith.index_cast %arg0 : i32 to index
    %c30 = arith.constant 30 : index
    %45 = memref.load %arg2[%44, %c30] : memref<2x36xf32, #tpu.memory_space<smem>>
    %46 = vector.extract_strided_slice %3 {offsets = [2, 0, 0], sizes = [1, 8, 128], strides = [1, 1, 1]} : vector<4x8x128xf32> to vector<1x8x128xf32>
    %47 = vector.shape_cast %46 : vector<1x8x128xf32> to vector<8x128xf32>
    %48 = vector.broadcast %45 : f32 to vector<8x128xf32>
    %49 = arith.mulf %48, %47 : vector<8x128xf32>
    %50 = arith.addf %43, %49 : vector<8x128xf32>
    %51 = arith.index_cast %arg0 : i32 to index
    %c31 = arith.constant 31 : index
    %52 = memref.load %arg2[%51, %c31] : memref<2x36xf32, #tpu.memory_space<smem>>
    %53 = vector.extract_strided_slice %3 {offsets = [3, 0, 0], sizes = [1, 8, 128], strides = [1, 1, 1]} : vector<4x8x128xf32> to vector<1x8x128xf32>
    %54 = vector.shape_cast %53 : vector<1x8x128xf32> to vector<8x128xf32>
    %55 = vector.broadcast %52 : f32 to vector<8x128xf32>
    %56 = arith.mulf %55, %54 : vector<8x128xf32>
    %57 = arith.addf %50, %56 : vector<8x128xf32>
    %58 = arith.index_cast %arg0 : i32 to index
    %c32 = arith.constant 32 : index
    %59 = memref.load %arg2[%58, %c32] : memref<2x36xf32, #tpu.memory_space<smem>>
    %60 = vector.extract_strided_slice %3 {offsets = [0, 0, 0], sizes = [1, 8, 128], strides = [1, 1, 1]} : vector<4x8x128xf32> to vector<1x8x128xf32>
    %61 = vector.shape_cast %60 : vector<1x8x128xf32> to vector<8x128xf32>
    %62 = vector.broadcast %59 : f32 to vector<8x128xf32>
    %63 = arith.mulf %62, %61 : vector<8x128xf32>
    %64 = arith.index_cast %arg0 : i32 to index
    %c33 = arith.constant 33 : index
    %65 = memref.load %arg2[%64, %c33] : memref<2x36xf32, #tpu.memory_space<smem>>
    %66 = vector.extract_strided_slice %3 {offsets = [1, 0, 0], sizes = [1, 8, 128], strides = [1, 1, 1]} : vector<4x8x128xf32> to vector<1x8x128xf32>
    %67 = vector.shape_cast %66 : vector<1x8x128xf32> to vector<8x128xf32>
    %68 = vector.broadcast %65 : f32 to vector<8x128xf32>
    %69 = arith.mulf %68, %67 : vector<8x128xf32>
    %70 = arith.addf %63, %69 : vector<8x128xf32>
    %71 = arith.index_cast %arg0 : i32 to index
    %c34 = arith.constant 34 : index
    %72 = memref.load %arg2[%71, %c34] : memref<2x36xf32, #tpu.memory_space<smem>>
    %73 = vector.extract_strided_slice %3 {offsets = [2, 0, 0], sizes = [1, 8, 128], strides = [1, 1, 1]} : vector<4x8x128xf32> to vector<1x8x128xf32>
    %74 = vector.shape_cast %73 : vector<1x8x128xf32> to vector<8x128xf32>
    %75 = vector.broadcast %72 : f32 to vector<8x128xf32>
    %76 = arith.mulf %75, %74 : vector<8x128xf32>
    %77 = arith.addf %70, %76 : vector<8x128xf32>
    %78 = arith.index_cast %arg0 : i32 to index
    %c35 = arith.constant 35 : index
    %79 = memref.load %arg2[%78, %c35] : memref<2x36xf32, #tpu.memory_space<smem>>
    %80 = vector.extract_strided_slice %3 {offsets = [3, 0, 0], sizes = [1, 8, 128], strides = [1, 1, 1]} : vector<4x8x128xf32> to vector<1x8x128xf32>
    %81 = vector.shape_cast %80 : vector<1x8x128xf32> to vector<8x128xf32>
    %82 = vector.broadcast %79 : f32 to vector<8x128xf32>
    %83 = arith.mulf %82, %81 : vector<8x128xf32>
    %84 = arith.addf %77, %83 : vector<8x128xf32>
    %85 = arith.index_cast %arg0 : i32 to index
    %c0_7 = arith.constant 0 : index
    %86 = memref.load %arg2[%85, %c0_7] : memref<2x36xf32, #tpu.memory_space<smem>>
    %87 = vector.extract_strided_slice %1 {offsets = [0, 0, 0], sizes = [1, 8, 128], strides = [1, 1, 1]} : vector<4x8x128xf32> to vector<1x8x128xf32>
    %88 = vector.shape_cast %87 : vector<1x8x128xf32> to vector<8x128xf32>
    %89 = vector.broadcast %86 : f32 to vector<8x128xf32>
    %90 = arith.mulf %89, %88 : vector<8x128xf32>
    %91 = arith.index_cast %arg0 : i32 to index
    %c1 = arith.constant 1 : index
    %92 = memref.load %arg2[%91, %c1] : memref<2x36xf32, #tpu.memory_space<smem>>
    %93 = vector.extract_strided_slice %1 {offsets = [1, 0, 0], sizes = [1, 8, 128], strides = [1, 1, 1]} : vector<4x8x128xf32> to vector<1x8x128xf32>
    %94 = vector.shape_cast %93 : vector<1x8x128xf32> to vector<8x128xf32>
    %95 = vector.broadcast %92 : f32 to vector<8x128xf32>
    %96 = arith.mulf %95, %94 : vector<8x128xf32>
    %97 = arith.addf %90, %96 : vector<8x128xf32>
    %98 = arith.index_cast %arg0 : i32 to index
    %c2 = arith.constant 2 : index
    %99 = memref.load %arg2[%98, %c2] : memref<2x36xf32, #tpu.memory_space<smem>>
    %100 = vector.extract_strided_slice %1 {offsets = [2, 0, 0], sizes = [1, 8, 128], strides = [1, 1, 1]} : vector<4x8x128xf32> to vector<1x8x128xf32>
    %101 = vector.shape_cast %100 : vector<1x8x128xf32> to vector<8x128xf32>
    %102 = vector.broadcast %99 : f32 to vector<8x128xf32>
    %103 = arith.mulf %102, %101 : vector<8x128xf32>
    %104 = arith.addf %97, %103 : vector<8x128xf32>
    %105 = arith.index_cast %arg0 : i32 to index
    %c3 = arith.constant 3 : index
    %106 = memref.load %arg2[%105, %c3] : memref<2x36xf32, #tpu.memory_space<smem>>
    %107 = vector.extract_strided_slice %1 {offsets = [3, 0, 0], sizes = [1, 8, 128], strides = [1, 1, 1]} : vector<4x8x128xf32> to vector<1x8x128xf32>
    %108 = vector.shape_cast %107 : vector<1x8x128xf32> to vector<8x128xf32>
    %109 = vector.broadcast %106 : f32 to vector<8x128xf32>
    %110 = arith.mulf %109, %108 : vector<8x128xf32>
    %111 = arith.addf %104, %110 : vector<8x128xf32>
    %112 = arith.index_cast %arg0 : i32 to index
    %c4 = arith.constant 4 : index
    %113 = memref.load %arg2[%112, %c4] : memref<2x36xf32, #tpu.memory_space<smem>>
    %114 = vector.extract_strided_slice %1 {offsets = [0, 0, 0], sizes = [1, 8, 128], strides = [1, 1, 1]} : vector<4x8x128xf32> to vector<1x8x128xf32>
    %115 = vector.shape_cast %114 : vector<1x8x128xf32> to vector<8x128xf32>
    %116 = vector.broadcast %113 : f32 to vector<8x128xf32>
    %117 = arith.mulf %116, %115 : vector<8x128xf32>
    %118 = arith.index_cast %arg0 : i32 to index
    %c5 = arith.constant 5 : index
    %119 = memref.load %arg2[%118, %c5] : memref<2x36xf32, #tpu.memory_space<smem>>
    %120 = vector.extract_strided_slice %1 {offsets = [1, 0, 0], sizes = [1, 8, 128], strides = [1, 1, 1]} : vector<4x8x128xf32> to vector<1x8x128xf32>
    %121 = vector.shape_cast %120 : vector<1x8x128xf32> to vector<8x128xf32>
    %122 = vector.broadcast %119 : f32 to vector<8x128xf32>
    %123 = arith.mulf %122, %121 : vector<8x128xf32>
    %124 = arith.addf %117, %123 : vector<8x128xf32>
    %125 = arith.index_cast %arg0 : i32 to index
    %c6 = arith.constant 6 : index
    %126 = memref.load %arg2[%125, %c6] : memref<2x36xf32, #tpu.memory_space<smem>>
    %127 = vector.extract_strided_slice %1 {offsets = [2, 0, 0], sizes = [1, 8, 128], strides = [1, 1, 1]} : vector<4x8x128xf32> to vector<1x8x128xf32>
    %128 = vector.shape_cast %127 : vector<1x8x128xf32> to vector<8x128xf32>
    %129 = vector.broadcast %126 : f32 to vector<8x128xf32>
    %130 = arith.mulf %129, %128 : vector<8x128xf32>
    %131 = arith.addf %124, %130 : vector<8x128xf32>
    %132 = arith.index_cast %arg0 : i32 to index
    %c7 = arith.constant 7 : index
    %133 = memref.load %arg2[%132, %c7] : memref<2x36xf32, #tpu.memory_space<smem>>
    %134 = vector.extract_strided_slice %1 {offsets = [3, 0, 0], sizes = [1, 8, 128], strides = [1, 1, 1]} : vector<4x8x128xf32> to vector<1x8x128xf32>
    %135 = vector.shape_cast %134 : vector<1x8x128xf32> to vector<8x128xf32>
    %136 = vector.broadcast %133 : f32 to vector<8x128xf32>
    %137 = arith.mulf %136, %135 : vector<8x128xf32>
    %138 = arith.addf %131, %137 : vector<8x128xf32>
    %139 = arith.index_cast %arg0 : i32 to index
    %c8 = arith.constant 8 : index
    %140 = memref.load %arg2[%139, %c8] : memref<2x36xf32, #tpu.memory_space<smem>>
    %141 = vector.extract_strided_slice %1 {offsets = [0, 0, 0], sizes = [1, 8, 128], strides = [1, 1, 1]} : vector<4x8x128xf32> to vector<1x8x128xf32>
    %142 = vector.shape_cast %141 : vector<1x8x128xf32> to vector<8x128xf32>
    %143 = vector.broadcast %140 : f32 to vector<8x128xf32>
    %144 = arith.mulf %143, %142 : vector<8x128xf32>
    %145 = arith.index_cast %arg0 : i32 to index
    %c9 = arith.constant 9 : index
    %146 = memref.load %arg2[%145, %c9] : memref<2x36xf32, #tpu.memory_space<smem>>
    %147 = vector.extract_strided_slice %1 {offsets = [1, 0, 0], sizes = [1, 8, 128], strides = [1, 1, 1]} : vector<4x8x128xf32> to vector<1x8x128xf32>
    %148 = vector.shape_cast %147 : vector<1x8x128xf32> to vector<8x128xf32>
    %149 = vector.broadcast %146 : f32 to vector<8x128xf32>
    %150 = arith.mulf %149, %148 : vector<8x128xf32>
    %151 = arith.addf %144, %150 : vector<8x128xf32>
    %152 = arith.index_cast %arg0 : i32 to index
    %c10 = arith.constant 10 : index
    %153 = memref.load %arg2[%152, %c10] : memref<2x36xf32, #tpu.memory_space<smem>>
    %154 = vector.extract_strided_slice %1 {offsets = [2, 0, 0], sizes = [1, 8, 128], strides = [1, 1, 1]} : vector<4x8x128xf32> to vector<1x8x128xf32>
    %155 = vector.shape_cast %154 : vector<1x8x128xf32> to vector<8x128xf32>
    %156 = vector.broadcast %153 : f32 to vector<8x128xf32>
    %157 = arith.mulf %156, %155 : vector<8x128xf32>
    %158 = arith.addf %151, %157 : vector<8x128xf32>
    %159 = arith.index_cast %arg0 : i32 to index
    %c11 = arith.constant 11 : index
    %160 = memref.load %arg2[%159, %c11] : memref<2x36xf32, #tpu.memory_space<smem>>
    %161 = vector.extract_strided_slice %1 {offsets = [3, 0, 0], sizes = [1, 8, 128], strides = [1, 1, 1]} : vector<4x8x128xf32> to vector<1x8x128xf32>
    %162 = vector.shape_cast %161 : vector<1x8x128xf32> to vector<8x128xf32>
    %163 = vector.broadcast %160 : f32 to vector<8x128xf32>
    %164 = arith.mulf %163, %162 : vector<8x128xf32>
    %165 = arith.addf %158, %164 : vector<8x128xf32>
    %166 = arith.index_cast %arg0 : i32 to index
    %c12 = arith.constant 12 : index
    %167 = memref.load %arg2[%166, %c12] : memref<2x36xf32, #tpu.memory_space<smem>>
    %168 = vector.extract_strided_slice %1 {offsets = [0, 0, 0], sizes = [1, 8, 128], strides = [1, 1, 1]} : vector<4x8x128xf32> to vector<1x8x128xf32>
    %169 = vector.shape_cast %168 : vector<1x8x128xf32> to vector<8x128xf32>
    %170 = vector.broadcast %167 : f32 to vector<8x128xf32>
    %171 = arith.mulf %170, %169 : vector<8x128xf32>
    %172 = arith.index_cast %arg0 : i32 to index
    %c13 = arith.constant 13 : index
    %173 = memref.load %arg2[%172, %c13] : memref<2x36xf32, #tpu.memory_space<smem>>
    %174 = vector.extract_strided_slice %1 {offsets = [1, 0, 0], sizes = [1, 8, 128], strides = [1, 1, 1]} : vector<4x8x128xf32> to vector<1x8x128xf32>
    %175 = vector.shape_cast %174 : vector<1x8x128xf32> to vector<8x128xf32>
    %176 = vector.broadcast %173 : f32 to vector<8x128xf32>
    %177 = arith.mulf %176, %175 : vector<8x128xf32>
    %178 = arith.addf %171, %177 : vector<8x128xf32>
    %179 = arith.index_cast %arg0 : i32 to index
    %c14 = arith.constant 14 : index
    %180 = memref.load %arg2[%179, %c14] : memref<2x36xf32, #tpu.memory_space<smem>>
    %181 = vector.extract_strided_slice %1 {offsets = [2, 0, 0], sizes = [1, 8, 128], strides = [1, 1, 1]} : vector<4x8x128xf32> to vector<1x8x128xf32>
    %182 = vector.shape_cast %181 : vector<1x8x128xf32> to vector<8x128xf32>
    %183 = vector.broadcast %180 : f32 to vector<8x128xf32>
    %184 = arith.mulf %183, %182 : vector<8x128xf32>
    %185 = arith.addf %178, %184 : vector<8x128xf32>
    %186 = arith.index_cast %arg0 : i32 to index
    %c15 = arith.constant 15 : index
    %187 = memref.load %arg2[%186, %c15] : memref<2x36xf32, #tpu.memory_space<smem>>
    %188 = vector.extract_strided_slice %1 {offsets = [3, 0, 0], sizes = [1, 8, 128], strides = [1, 1, 1]} : vector<4x8x128xf32> to vector<1x8x128xf32>
    %189 = vector.shape_cast %188 : vector<1x8x128xf32> to vector<8x128xf32>
    %190 = vector.broadcast %187 : f32 to vector<8x128xf32>
    %191 = arith.mulf %190, %189 : vector<8x128xf32>
    %192 = arith.addf %185, %191 : vector<8x128xf32>
    %193 = arith.index_cast %arg0 : i32 to index
    %c16 = arith.constant 16 : index
    %194 = memref.load %arg2[%193, %c16] : memref<2x36xf32, #tpu.memory_space<smem>>
    %195 = vector.extract_strided_slice %1 {offsets = [0, 0, 0], sizes = [1, 8, 128], strides = [1, 1, 1]} : vector<4x8x128xf32> to vector<1x8x128xf32>
    %196 = vector.shape_cast %195 : vector<1x8x128xf32> to vector<8x128xf32>
    %197 = vector.broadcast %194 : f32 to vector<8x128xf32>
    %198 = arith.mulf %197, %196 : vector<8x128xf32>
    %199 = arith.index_cast %arg0 : i32 to index
    %c17 = arith.constant 17 : index
    %200 = memref.load %arg2[%199, %c17] : memref<2x36xf32, #tpu.memory_space<smem>>
    %201 = vector.extract_strided_slice %1 {offsets = [1, 0, 0], sizes = [1, 8, 128], strides = [1, 1, 1]} : vector<4x8x128xf32> to vector<1x8x128xf32>
    %202 = vector.shape_cast %201 : vector<1x8x128xf32> to vector<8x128xf32>
    %203 = vector.broadcast %200 : f32 to vector<8x128xf32>
    %204 = arith.mulf %203, %202 : vector<8x128xf32>
    %205 = arith.addf %198, %204 : vector<8x128xf32>
    %206 = arith.index_cast %arg0 : i32 to index
    %c18 = arith.constant 18 : index
    %207 = memref.load %arg2[%206, %c18] : memref<2x36xf32, #tpu.memory_space<smem>>
    %208 = vector.extract_strided_slice %1 {offsets = [2, 0, 0], sizes = [1, 8, 128], strides = [1, 1, 1]} : vector<4x8x128xf32> to vector<1x8x128xf32>
    %209 = vector.shape_cast %208 : vector<1x8x128xf32> to vector<8x128xf32>
    %210 = vector.broadcast %207 : f32 to vector<8x128xf32>
    %211 = arith.mulf %210, %209 : vector<8x128xf32>
    %212 = arith.addf %205, %211 : vector<8x128xf32>
    %213 = arith.index_cast %arg0 : i32 to index
    %c19 = arith.constant 19 : index
    %214 = memref.load %arg2[%213, %c19] : memref<2x36xf32, #tpu.memory_space<smem>>
    %215 = vector.extract_strided_slice %1 {offsets = [3, 0, 0], sizes = [1, 8, 128], strides = [1, 1, 1]} : vector<4x8x128xf32> to vector<1x8x128xf32>
    %216 = vector.shape_cast %215 : vector<1x8x128xf32> to vector<8x128xf32>
    %217 = vector.broadcast %214 : f32 to vector<8x128xf32>
    %218 = arith.mulf %217, %216 : vector<8x128xf32>
    %219 = arith.addf %212, %218 : vector<8x128xf32>
    %220 = arith.index_cast %arg0 : i32 to index
    %c20 = arith.constant 20 : index
    %221 = memref.load %arg2[%220, %c20] : memref<2x36xf32, #tpu.memory_space<smem>>
    %222 = vector.extract_strided_slice %1 {offsets = [0, 0, 0], sizes = [1, 8, 128], strides = [1, 1, 1]} : vector<4x8x128xf32> to vector<1x8x128xf32>
    %223 = vector.shape_cast %222 : vector<1x8x128xf32> to vector<8x128xf32>
    %224 = vector.broadcast %221 : f32 to vector<8x128xf32>
    %225 = arith.mulf %224, %223 : vector<8x128xf32>
    %226 = arith.index_cast %arg0 : i32 to index
    %c21 = arith.constant 21 : index
    %227 = memref.load %arg2[%226, %c21] : memref<2x36xf32, #tpu.memory_space<smem>>
    %228 = vector.extract_strided_slice %1 {offsets = [1, 0, 0], sizes = [1, 8, 128], strides = [1, 1, 1]} : vector<4x8x128xf32> to vector<1x8x128xf32>
    %229 = vector.shape_cast %228 : vector<1x8x128xf32> to vector<8x128xf32>
    %230 = vector.broadcast %227 : f32 to vector<8x128xf32>
    %231 = arith.mulf %230, %229 : vector<8x128xf32>
    %232 = arith.addf %225, %231 : vector<8x128xf32>
    %233 = arith.index_cast %arg0 : i32 to index
    %c22 = arith.constant 22 : index
    %234 = memref.load %arg2[%233, %c22] : memref<2x36xf32, #tpu.memory_space<smem>>
    %235 = vector.extract_strided_slice %1 {offsets = [2, 0, 0], sizes = [1, 8, 128], strides = [1, 1, 1]} : vector<4x8x128xf32> to vector<1x8x128xf32>
    %236 = vector.shape_cast %235 : vector<1x8x128xf32> to vector<8x128xf32>
    %237 = vector.broadcast %234 : f32 to vector<8x128xf32>
    %238 = arith.mulf %237, %236 : vector<8x128xf32>
    %239 = arith.addf %232, %238 : vector<8x128xf32>
    %240 = arith.index_cast %arg0 : i32 to index
    %c23 = arith.constant 23 : index
    %241 = memref.load %arg2[%240, %c23] : memref<2x36xf32, #tpu.memory_space<smem>>
    %242 = vector.extract_strided_slice %1 {offsets = [3, 0, 0], sizes = [1, 8, 128], strides = [1, 1, 1]} : vector<4x8x128xf32> to vector<1x8x128xf32>
    %243 = vector.shape_cast %242 : vector<1x8x128xf32> to vector<8x128xf32>
    %244 = vector.broadcast %241 : f32 to vector<8x128xf32>
    %245 = arith.mulf %244, %243 : vector<8x128xf32>
    %246 = arith.addf %239, %245 : vector<8x128xf32>
    %247 = arith.addf %111, %30 : vector<8x128xf32>
    %248 = arith.addf %138, %57 : vector<8x128xf32>
    %249 = arith.addf %165, %84 : vector<8x128xf32>
    %250 = arith.addf %192, %30 : vector<8x128xf32>
    %251 = arith.addf %219, %57 : vector<8x128xf32>
    %252 = arith.addf %246, %84 : vector<8x128xf32>
    %cst = arith.constant 1.000000e-07 : f32
    %253 = vector.broadcast %cst : f32 to vector<8x128xf32>
    %254 = arith.addf %249, %253 : vector<8x128xf32>
    %255 = tpu.reciprocal %254 {approx = true} : vector<8x128xf32> -> vector<8x128xf32>
    %256 = arith.mulf %254, %255 : vector<8x128xf32>
    %cst_8 = arith.constant 2.000000e+00 : f32
    %257 = vector.broadcast %cst_8 : f32 to vector<8x128xf32>
    %258 = arith.subf %257, %256 : vector<8x128xf32>
    %259 = arith.mulf %255, %258 : vector<8x128xf32>
    %cst_9 = arith.constant 1.000000e-07 : f32
    %260 = vector.broadcast %cst_9 : f32 to vector<8x128xf32>
    %261 = arith.addf %252, %260 : vector<8x128xf32>
    %262 = tpu.reciprocal %261 {approx = true} : vector<8x128xf32> -> vector<8x128xf32>
    %263 = arith.mulf %261, %262 : vector<8x128xf32>
    %cst_10 = arith.constant 2.000000e+00 : f32
    %264 = vector.broadcast %cst_10 : f32 to vector<8x128xf32>
    %265 = arith.subf %264, %263 : vector<8x128xf32>
    %266 = arith.mulf %262, %265 : vector<8x128xf32>
    %cst_11 = arith.constant 1.000000e-07 : f32
    %267 = vector.broadcast %cst_11 : f32 to vector<8x128xf32>
    %268 = arith.addf %84, %267 : vector<8x128xf32>
    %269 = tpu.reciprocal %268 {approx = true} : vector<8x128xf32> -> vector<8x128xf32>
    %270 = arith.mulf %268, %269 : vector<8x128xf32>
    %cst_12 = arith.constant 2.000000e+00 : f32
    %271 = vector.broadcast %cst_12 : f32 to vector<8x128xf32>
    %272 = arith.subf %271, %270 : vector<8x128xf32>
    %273 = arith.mulf %269, %272 : vector<8x128xf32>
    %274 = arith.mulf %247, %259 : vector<8x128xf32>
    %c0_13 = arith.constant 0 : index
    %c0_14 = arith.constant 0 : index
    %c0_15 = arith.constant 0 : index
    %c0_16 = arith.constant 0 : index
    %275 = vector.load %arg5[%c0_13, %c0_14, %c0_15, %c0_16] : memref<1x2x8x128xf32, #tpu.memory_space<vmem>>, vector<1x1x8x128xf32>
    %276 = vector.shape_cast %275 : vector<1x1x8x128xf32> to vector<8x128xf32>
    %277 = vector.shape_cast %274 : vector<8x128xf32> to vector<1x1x8x128xf32>
    tpu.vector_store %arg5[%c0_13, %c0_14, %c0_15, %c0_16], %277 {strides = array<i32>} : memref<1x2x8x128xf32, #tpu.memory_space<vmem>>, vector<1x1x8x128xf32>,
    %278 = arith.mulf %248, %259 : vector<8x128xf32>
    %c0_17 = arith.constant 0 : index
    %c1_18 = arith.constant 1 : index
    %c0_19 = arith.constant 0 : index
    %c0_20 = arith.constant 0 : index
    %279 = vector.load %arg5[%c0_17, %c1_18, %c0_19, %c0_20] : memref<1x2x8x128xf32, #tpu.memory_space<vmem>>, vector<1x1x8x128xf32>
    %280 = vector.shape_cast %279 : vector<1x1x8x128xf32> to vector<8x128xf32>
    %281 = vector.shape_cast %278 : vector<8x128xf32> to vector<1x1x8x128xf32>
    tpu.vector_store %arg5[%c0_17, %c1_18, %c0_19, %c0_20], %281 {strides = array<i32>} : memref<1x2x8x128xf32, #tpu.memory_space<vmem>>, vector<1x1x8x128xf32>,
    %282 = arith.mulf %250, %266 : vector<8x128xf32>
    %c0_21 = arith.constant 0 : index
    %c0_22 = arith.constant 0 : index
    %c0_23 = arith.constant 0 : index
    %c0_24 = arith.constant 0 : index
    %283 = vector.load %arg6[%c0_21, %c0_22, %c0_23, %c0_24] : memref<1x2x8x128xf32, #tpu.memory_space<vmem>>, vector<1x1x8x128xf32>
    %284 = vector.shape_cast %283 : vector<1x1x8x128xf32> to vector<8x128xf32>
    %285 = vector.shape_cast %282 : vector<8x128xf32> to vector<1x1x8x128xf32>
    tpu.vector_store %arg6[%c0_21, %c0_22, %c0_23, %c0_24], %285 {strides = array<i32>} : memref<1x2x8x128xf32, #tpu.memory_space<vmem>>, vector<1x1x8x128xf32>,
    %286 = arith.mulf %251, %266 : vector<8x128xf32>
    %c0_25 = arith.constant 0 : index
    %c1_26 = arith.constant 1 : index
    %c0_27 = arith.constant 0 : index
    %c0_28 = arith.constant 0 : index
    %287 = vector.load %arg6[%c0_25, %c1_26, %c0_27, %c0_28] : memref<1x2x8x128xf32, #tpu.memory_space<vmem>>, vector<1x1x8x128xf32>
    %288 = vector.shape_cast %287 : vector<1x1x8x128xf32> to vector<8x128xf32>
    %289 = vector.shape_cast %286 : vector<8x128xf32> to vector<1x1x8x128xf32>
    tpu.vector_store %arg6[%c0_25, %c1_26, %c0_27, %c0_28], %289 {strides = array<i32>} : memref<1x2x8x128xf32, #tpu.memory_space<vmem>>, vector<1x1x8x128xf32>,
    %290 = arith.mulf %30, %273 : vector<8x128xf32>
    %cst_29 = arith.constant 0.13333334 : f32
    %291 = vector.broadcast %cst_29 : f32 to vector<8x128xf32>
    %292 = arith.mulf %290, %291 : vector<8x128xf32>
    %cst_30 = arith.constant 1.000000e+00 : f32
    %293 = vector.broadcast %cst_30 : f32 to vector<8x128xf32>
    %294 = arith.subf %292, %293 : vector<8x128xf32>
    %c0_31 = arith.constant 0 : index
    %c0_32 = arith.constant 0 : index
    %c0_33 = arith.constant 0 : index
    %c0_34 = arith.constant 0 : index
    %295 = vector.load %arg7[%c0_31, %c0_32, %c0_33, %c0_34] : memref<1x2x8x128xf32, #tpu.memory_space<vmem>>, vector<1x1x8x128xf32>
    %296 = vector.shape_cast %295 : vector<1x1x8x128xf32> to vector<8x128xf32>
    %297 = vector.shape_cast %294 : vector<8x128xf32> to vector<1x1x8x128xf32>
    tpu.vector_store %arg7[%c0_31, %c0_32, %c0_33, %c0_34], %297 {strides = array<i32>} : memref<1x2x8x128xf32, #tpu.memory_space<vmem>>, vector<1x1x8x128xf32>,
    %298 = arith.mulf %57, %273 : vector<8x128xf32>
    %cst_35 = arith.constant 0.13333334 : f32
    %299 = vector.broadcast %cst_35 : f32 to vector<8x128xf32>
    %300 = arith.mulf %298, %299 : vector<8x128xf32>
    %cst_36 = arith.constant 1.000000e+00 : f32
    %301 = vector.broadcast %cst_36 : f32 to vector<8x128xf32>
    %302 = arith.subf %300, %301 : vector<8x128xf32>
    %c0_37 = arith.constant 0 : index
    %c1_38 = arith.constant 1 : index
    %c0_39 = arith.constant 0 : index
    %c0_40 = arith.constant 0 : index
    %303 = vector.load %arg7[%c0_37, %c1_38, %c0_39, %c0_40] : memref<1x2x8x128xf32, #tpu.memory_space<vmem>>, vector<1x1x8x128xf32>
    %304 = vector.shape_cast %303 : vector<1x1x8x128xf32> to vector<8x128xf32>
    %305 = vector.shape_cast %302 : vector<8x128xf32> to vector<1x1x8x128xf32>
    tpu.vector_store %arg7[%c0_37, %c1_38, %c0_39, %c0_40], %305 {strides = array<i32>} : memref<1x2x8x128xf32, #tpu.memory_space<vmem>>, vector<1x1x8x128xf32>,
    return
  }
  func.func @transform_0(%arg0: i32, %arg1: i32) -> (i32, i32) {
    %c0_i32 = arith.constant 0 : i32
    %c0_i32_0 = arith.constant 0 : i32
    %c0_i32_1 = arith.constant 0 : i32
    return %c0_i32, %c0_i32_0 : i32, i32
  }
  func.func @transform_1(%arg0: i32, %arg1: i32) -> (i32, i32, i32, i32) {
    %c0_i32 = arith.constant 0 : i32
    %c0_i32_0 = arith.constant 0 : i32
    %c0_i32_1 = arith.constant 0 : i32
    return %arg0, %c0_i32, %arg1, %c0_i32_0 : i32, i32, i32, i32
  }
  func.func @transform_2(%arg0: i32, %arg1: i32) -> (i32, i32, i32, i32) {
    %c0_i32 = arith.constant 0 : i32
    %c0_i32_0 = arith.constant 0 : i32
    %c0_i32_1 = arith.constant 0 : i32
    return %arg0, %c0_i32, %arg1, %c0_i32_0 : i32, i32, i32, i32
  }
  func.func @transform_3(%arg0: i32, %arg1: i32) -> (i32, i32, i32, i32) {
    %c0_i32 = arith.constant 0 : i32
    %c0_i32_0 = arith.constant 0 : i32
    %c0_i32_1 = arith.constant 0 : i32
    return %arg0, %c0_i32, %arg1, %c0_i32_0 : i32, i32, i32, i32
  }
  func.func @transform_4(%arg0: i32, %arg1: i32) -> (i32, i32, i32, i32) {
    %c0_i32 = arith.constant 0 : i32
    %c0_i32_0 = arith.constant 0 : i32
    %c0_i32_1 = arith.constant 0 : i32
    return %arg0, %c0_i32, %arg1, %c0_i32_0 : i32, i32, i32, i32
  }
  func.func @transform_5(%arg0: i32, %arg1: i32) -> (i32, i32, i32, i32) {
    %c0_i32 = arith.constant 0 : i32
    %c0_i32_0 = arith.constant 0 : i32
    %c0_i32_1 = arith.constant 0 : i32
    return %arg0, %c0_i32, %arg1, %c0_i32_0 : i32, i32, i32, i32
  }
}

</mosaic_0001>

<bundles_post_ra>
// kernel: tpu_custom_call.1
= control target key start
LH: loop header
LB: loop body
LE: loop exit
PB: predicated region body
PF: predicated region fallthrough
CT: control target
= control target key end

     0   :  { %s1772_s0 = inlined_call_operand.hbm [shape: f32[2,36], index: 0, kind: input, shape index: {}]   ;;  %s1773_s1 = inlined_call_operand.hbm [shape: f32[2,4,8,128], index: 1, kind: input, shape index: {}]   ;;  %s1774_s2 = inlined_call_operand.hbm [shape: f32[2,4,8,128], index: 2, kind: input, shape index: {}]   ;;  %s1775_s3 = inlined_call_operand.hbm [shape: f32[2,2,8,128], index: 3, kind: output, shape index: {0}]   ;;  %s1776_s4 = inlined_call_operand.hbm [shape: f32[2,2,8,128], index: 4, kind: output, shape index: {1}]   ;;  %s1777_s5 = inlined_call_operand.hbm [shape: f32[2,2,8,128], index: 5, kind: output, shape index: {2}]  }
   0x1   :  { %1786 = sst [smem:[#allocation22_spill]] %s1772_s0 }
   0x2   :  { %1787 = sst [smem:[#allocation23_spill]] %s1773_s1 }
   0x3   :  { %1788 = sst [smem:[#allocation24_spill]] %s1774_s2 }
   0x4   :  { %11 = vsyncpa [#allocation5], 0 }
   0x5   :  { %12 = vsyncpa [#allocation3], 0 }
   0x6   :  { %14 = vsyncpa [#allocation3 + $0x1], 0 }
   0x7   :  { %15 = vsyncpa [#allocation8], 0 }
   0x8   :  { %17 = vsyncpa [#allocation8 + $0x1], 0 }
   0x9   :  { %18 = vsyncpa [#allocation4], 0 }
   0xa   :  { %20 = vsyncpa [#allocation4 + $0x1], 0 }
   0xb   :  { %21 = vsyncpa [#allocation11], 0 }
   0xc   :  { %23 = vsyncpa [#allocation11 + $0x1], 0  ;;  %s1205_s18 = smov 0   ;;  %s1207_s19 = smov 0  }
   0xd   :  { %s1209_s20 = smov 0   ;;  %s1211_s21 = smov 0  }
   0xe   :  { %s1213_s22 = smov 0   ;;  %s1215_s23 = smov 0  }
   0xf LB: > { %1789 = sst [smem:[#allocation18_spill]] %s1151_s20  ;;  %s1236_s24 = sadd.s32 4294967295, %s1163_s23   ;;  %s1163_s23 = sphi %s1215_s23, %s29_s23   ;;  %s1159_s22 = sphi %s1213_s22, %s1813_s22   ;;  %s1155_s21 = sphi %s1211_s21, %s1812_s21   ;;  %s1151_s20 = sphi %s1209_s20, %s1811_s20   ;;  %s1147_s19 = sphi %s1207_s19, %s1815_s19   ;;  %s1143_s18 = sphi %s1205_s18, %s1814_s18  }
  0x10   : > { %1790 = sst [smem:[#allocation19_spill]] %s1159_s22  ;;  %s1778_s25 = sadd.s32 4294967294, %s1163_s23  }
  0x11   : > { %p78_p0 = scmp.ne.s32.totalorder %s1151_s20, %s1147_s19  ;;  %p79_p1 = scmp.eq.s32.totalorder %s1163_s23, 0 }
  0x12   : > { %p84_p2 = scmp.ne.s32.totalorder %s1147_s19, %s1143_s18  ;;  %p1780_p3 = scmp.eq.s32.totalorder %s1236_s24, 0 }
  0x13   : > { %p138_p4 = scmp.eq.s32.totalorder %s1236_s24, 1  ;;  %p80_p5 = por %p79_p1, %p78_p0 }
  0x14   : > { %p144_p6 = scmp.eq.s32.totalorder %s1778_s25, 1  ;;  %p1251_p7 = por %p1780_p3, %p84_p2 }
  0x15   : > { %p1255_p8 = por %p138_p4, %p78_p0  ;;  %p804_p10 = scmp.ge.s32.totalorder %s1163_s23, 1 }
  0x16   : > { %s1791_s27 = scalar_select %p1251_p7, 1, 0 }
  0x17   : > { %s1792_s28 = scalar_select %p1255_p8, 1, 0 }
  0x18   : > { %p1259_p9 = por %p144_p6, %p84_p2  ;;  %p207_p11 = scmp.lt.s32.totalorder %s1163_s23, 3 }
  0x19   : > { %p878_p1 = scmp.lt.s32.totalorder %s1163_s23, 2  ;;  %s1272_s6 = sand.u32 1, %s1151_s20  }
  0x1a   : > { %s1793_s29 = scalar_select %p1259_p9, 1, 0 }
  0x1b   : > { %p1266_p13 = pnand %p804_p10, %p207_p11  ;;  %p1276_p4 = pnand %p878_p1, %p80_p5 }
  0x1c   : > { %s41_s8 = sadd.s32 1, %s1159_s22  ;;  %s1779_s9 = sshll.u32 %s1272_s6, 5 }
  0x1d   : > { %p856_p0 = pneg %p1266_p13  ;;  %p43_p6 = scmp.ge.s32.totalorder %s41_s8, 2 }
  0x1e   : > { %s1796_s0 = sld [smem:[#allocation22_spill]] }
  0x1f   : > { %p857_p2 = pnand %p856_p0, %p1780_p3 }
  0x21   : > { %p942_p11 = pneg %p857_p2 }
  0x24   : > { %s940_s12 = scalar_lea.hbm %s1796_s0, 32 }
  0x25   : > { %p941_p10 = scmp.ne.s32.totalorder %s1796_s0, %s940_s12  ;;  %p947_p5 = scmp.lt.u32.totalorder %s940_s12, %s1796_s0 }
  0x27   : > { %p943_p12 = pnand %p942_p11, %p941_p10 }
  0x29   : > { %p944_p9 = pneg %p943_p12 }
  0x2b   : > { %p949_p1 = pnand %p947_p5, %p944_p9 }
  0x2d   : > { %952 = shalt.err (!%p949_p1)
}
  0x2e   : > { %s1165_s17 = smov [#allocation2]   ;;  %s1817_s8 = smov (%p43_p6, %s41_s8), 0 }
  0x2f   : > { %859 = dma.hbm_to_smem (!%p857_p2), %s1796_s0, 32, %s1165_s17, [#allocation5]  }
  0x30   : > { %1797 = sst [smem:[#allocation20_spill]] %s1817_s8  ;;  %s837_s10 = sshll.u32 %s1159_s22, 9 }
  0x31   : > { %s66_s11 = ssub.s32 %s1159_s22, %s1817_s8  ;;  %s1798_s1 = sld [smem:[#allocation23_spill]] }
  0x32   : > { %p69_p9 = scmp.eq.s32.totalorder %s66_s11, 0  ;;  %s233_s26 = scalar_lea.vmem [#allocation6], %s1779_s9 }
  0x33   : > { %s241_s14 = sshll.u32 %s233_s26, 4  ;;  %s1799_s15 = sadd.s32 1, %s1151_s20  ;;  %s1310_s14 = int_to_ptr.vmem [resolvable:$true] %s241_s14 }
  0x34   : > { %s1315_s16 = scalar_select %p69_p9, %s1151_s20, %s1799_s15  }
  0x35   : > { %s230_s17 = scalar_lea.sflag [#allocation3], %s1272_s6  ;;  %p955_p0 = pneg %p1276_p4 }
  0x36   : > { %1800 = sst [smem:[#allocation21_spill]] %s1315_s16 }
  0x37   : > { %s1306_s25 = scalar_lea.hbm %s1798_s1, %s837_s10  ;;  %s958_s11 = scalar_lea.hbm %s1798_s1, 1024 }
  0x38   : > { %s953_s0 = scalar_lea.hbm %s1306_s25, 512  ;;  %p959_p10 = scmp.lt.u32.totalorder %s1306_s25, %s1798_s1 }
  0x39   : > { %p954_p12 = scmp.ne.s32.totalorder %s1306_s25, %s953_s0  ;;  %p960_p11 = scmp.lt.u32.totalorder %s958_s11, %s953_s0 }
  0x3a   : > { %p962_p1 = scmp.lt.u32.totalorder %s953_s0, %s1306_s25 }
  0x3b   : > { %p956_p2 = pnand %p955_p0, %p954_p12  ;;  %p961_p5 = por %p960_p11, %p959_p10 }
  0x3d   : > { %p957_p6 = pneg %p956_p2  ;;  %p963_p9 = por %p962_p1, %p961_p5 }
  0x3f   : > { %p964_p3 = pnand %p963_p9, %p957_p6 }
  0x41   : > { %967 = shalt.err (!%p964_p3)
}
  0x42   : > { %s968_s15 = scalar_lea.vmem %s1310_s14, 512  ;;  %s1166_s12 = smov [#allocation6]  }
  0x43   : > { %p969_p12 = scmp.ne.s32.totalorder %s1310_s14, %s968_s15  ;;  %s973_s13 = sshll.u32 %s1166_s12, 4  ;;  %s974_s13 = int_to_ptr.vmem [resolvable:$false] %s973_s13 }
  0x44   : > { %s975_s9 = scalar_lea.vmem %s974_s13, 1024  ;;  %p976_p7 = scmp.lt.s32.totalorder %s1310_s14, %s974_s13 }
  0x45   : > { %p971_p2 = pnand %p969_p12, %p955_p0  ;;  %p977_p10 = scmp.lt.s32.totalorder %s975_s9, %s968_s15 }
  0x47   : > { %p972_p8 = pneg %p971_p2  ;;  %p978_p11 = por %p977_p10, %p976_p7 }
  0x49   : > { %p979_p5 = pnand %p978_p11, %p972_p8 }
  0x4b   : > { %982 = shalt.err (!%p979_p5)
}
  0x4c   : > { %s1167_s0 = smov 128   ;;  %s1168_s11 = smov 8  }
  0x4d   : > { %863 = dma.hbm_to_vmem [thread:$0]  (!%p1276_p4), %s1306_s25, 512, %s1310_s14, %s230_s17, %s1167_s0, %s1167_s0, %s1168_s11  }
  0x4e   : > { %s1801_s2 = sld [smem:[#allocation24_spill]]  ;;  %s1802_s13 = sshll.u32 %s1272_s6, 5 }
  0x4f   : > { %s255_s9 = scalar_lea.vmem [#allocation7], %s1802_s13  ;;  %s252_s8 = scalar_lea.sflag [#allocation8], %s1272_s6 }
  0x50   : > { %s263_s1 = sshll.u32 %s255_s9, 4  ;;  %s1357_s1 = int_to_ptr.vmem [resolvable:$true] %s263_s1 }
  0x54   : > { %s1353_s12 = scalar_lea.hbm %s1801_s2, %s837_s10  ;;  %s988_s10 = scalar_lea.hbm %s1801_s2, 1024 }
  0x55   : > { %s983_s16 = scalar_lea.hbm %s1353_s12, 512  ;;  %p989_p6 = scmp.lt.u32.totalorder %s1353_s12, %s1801_s2 }
  0x56   : > { %p984_p3 = scmp.ne.s32.totalorder %s1353_s12, %s983_s16  ;;  %p990_p1 = scmp.lt.u32.totalorder %s988_s10, %s983_s16 }
  0x57   : > { %p992_p12 = scmp.lt.u32.totalorder %s983_s16, %s1353_s12 }
  0x58   : > { %p986_p7 = pnand %p984_p3, %p955_p0  ;;  %p991_p9 = por %p990_p1, %p989_p6 }
  0x5a   : > { %p987_p8 = pneg %p986_p7  ;;  %p993_p2 = por %p992_p12, %p991_p9 }
  0x5c   : > { %p994_p10 = pnand %p993_p2, %p987_p8 }
  0x5e   : > { %997 = shalt.err (!%p994_p10)
}
  0x5f   : > { %s998_s15 = scalar_lea.vmem %s1357_s1, 512  ;;  %s1169_s13 = smov [#allocation7]  }
  0x60   : > { %p999_p11 = scmp.ne.s32.totalorder %s1357_s1, %s998_s15  ;;  %s1003_s9 = sshll.u32 %s1169_s13, 4  ;;  %s1004_s9 = int_to_ptr.vmem [resolvable:$false] %s1003_s9 }
  0x61   : > { %s1005_s25 = scalar_lea.vmem %s1004_s9, 1024  ;;  %p1006_p7 = scmp.lt.s32.totalorder %s1357_s1, %s1004_s9 }
  0x62   : > { %p1001_p5 = pnand %p999_p11, %p955_p0  ;;  %p1007_p6 = scmp.lt.s32.totalorder %s1005_s25, %s998_s15 }
  0x64   : > { %p1002_p3 = pneg %p1001_p5  ;;  %p1008_p1 = por %p1007_p6, %p1006_p7 }
  0x66   : > { %p1009_p9 = pnand %p1008_p1, %p1002_p3 }
  0x68   : > { %1012 = shalt.err (!%p1009_p9)
}
  0x69   : > { %866 = dma.hbm_to_vmem [thread:$0]  (!%p1276_p4), %s1353_s12, 512, %s1357_s1, %s252_s8, %s1167_s0, %s1167_s0, %s1168_s11  }
  0x6a   : > { %275 = sbr.rel (%p1266_p13) target bundleno = 235 (0xeb), region = 32  ;;  %p1803_p0 = scmp.eq.s32.totalorder (!%p1266_p13), %s1236_s24, 0 }
  0x71   : > { %1122 = dma.done.wait (%p1803_p0), [#allocation5], 32   ;;  %p1804_p8 = pmov %p1803_p0 }
  0x72   : > { %s1395_s7 = sand.u32 1, %s1147_s19   ;;  %p1805_p4 = scmp.ne.s32.totalorder %s1791_s27, 0 }
  0x73   : > { %1124 = vsyncadd (%p1804_p8), [#allocation5], 4294967264  ;;  %s815_s16 = sshll.u32 %s1395_s7, 5  ;;  %s282_s6 = scalar_lea.sflag [#allocation3], %s1395_s7 }
  0x74   : > { %s1399_s14 = scalar_lea.vmem [#allocation6], %s815_s16 }
  0x75   : > { %1126 = dma.done.wait (%p1805_p4), %s282_s6, 512  }
  0x76   : > { %1128 = vsyncadd (%p1805_p4), %s282_s6, 4294966784  ;;  %s291_s1 = scalar_lea.sflag [#allocation8], %s1395_s7  ;;  %s294_s30 = scalar_lea.vmem [#allocation7], %s815_s16 }
  0x77   : > { %1130 = dma.done.wait (%p1805_p4), %s291_s1, 512  }
  0x78   : > { %1132 = vsyncadd (%p1805_p4), %s291_s1, 4294966784 }
  0x79   : > { %299 = sfence }
  0x7a   : > { %s1411_s8 = sshll.u32 %s1155_s21, 7  ;;  %v1424_v0 = vld [vmem:[%s294_s30] sm:$0xff]  ;;  %v1429_v1 = vld [vmem:[%s294_s30 + $0x8] sm:$0xff]  ;;  %v1435_v2 = vld [vmem:[%s294_s30 + $0x10] sm:$0xff]  ;;  %p1806_p12 = scmp.ne.s32.totalorder %s1792_s28, 0 }
  0x7b   : > { %s346_s0 = sadd.s32 24, %s1411_s8  ;;  %s350_s12 = sadd.s32 25, %s1411_s8  ;;  %v1441_v4 = vld [vmem:[%s294_s30 + $0x18] sm:$0xff]  ;;  %v1457_v13 = vld [vmem:[%s1399_s14] sm:$0xff]  ;;  %v1462_v15 = vld [vmem:[%s1399_s14 + $0x8] sm:$0xff] }
  0x7c   : > { %s1414_s11 = sld [smem:[#allocation2 + %s346_s0]]  ;;  %s355_s27 = sadd.s32 26, %s1411_s8  ;;  %v1468_v16 = vld [vmem:[%s1399_s14 + $0x10] sm:$0xff]  ;;  %v1477_v20 = vld [vmem:[%s1399_s14 + $0x18] sm:$0xff] }
  0x7d   : > { %s360_s10 = sadd.s32 27, %s1411_s8  ;;  %s384_s17 = sadd.s32 32, %s1411_s8 }
  0x7e   : > { %s385_s26 = sld [smem:[#allocation2 + %s384_s17]]  ;;  %s388_s15 = sadd.s32 33, %s1411_s8 }
  0x7f   : > { %s389_s13 = sld [smem:[#allocation2 + %s388_s15]]  ;;  %s393_s9 = sadd.s32 34, %s1411_s8 }
  0x80   : > { %s394_s25 = sld [smem:[#allocation2 + %s393_s9]]  ;;  %s398_s16 = sadd.s32 35, %s1411_s8 }
  0x81   : > { %s399_s6 = sld [smem:[#allocation2 + %s398_s16]]  ;;  %s459_s1 = sadd.s32 12, %s1411_s8 }
  0x82   : > { %s1426_s2 = sld [smem:[#allocation2 + %s350_s12]]  ;;  %s463_s0 = sadd.s32 13, %s1411_s8  ;;  %v348_v17 = vstv %s1414_s11 }
  0x83   : > { %s1431_s22 = sld [smem:[#allocation2 + %s355_s27]]  ;;  %s468_s12 = sadd.s32 14, %s1411_s8  ;;  %v349_v27 = vmul.f32 %v348_v17, %v1424_v0 }
  0x84   : > { %s1433_s17 = sld [smem:[#allocation2 + %s360_s10]]  ;;  %v386_v3 = vstv %s385_s26  ;;  %s497_s27 = sadd.s32 20, %s1411_s8 }
  0x85   : > { %s1437_s15 = sld [smem:[#allocation2 + %s459_s1]]  ;;  %v387_v5 = vmul.f32 %v386_v3, %v1424_v0  ;;  %v390_v6 = vstv %s389_s13  ;;  %s501_s26 = sadd.s32 21, %s1411_s8 }
  0x86   : > { %s1439_s9 = sld [smem:[#allocation2 + %s463_s0]]  ;;  %v391_v7 = vmul.f32 %v390_v6, %v1429_v1  ;;  %v395_v8 = vstv %s394_s25  ;;  %s506_s16 = sadd.s32 22, %s1411_s8 }
  0x87   : > { %s498_s10 = sld [smem:[#allocation2 + %s497_s27]]  ;;  %v396_v9 = vmul.f32 %v395_v8, %v1435_v2  ;;  %v400_v10 = vstv %s399_s6  ;;  %s511_s1 = sadd.s32 23, %s1411_s8 }
  0x88   : > { %s502_s30 = sld [smem:[#allocation2 + %s501_s26]]  ;;  %v392_v11 = vadd.f32 %v391_v7, %v387_v5  ;;  %v401_v12 = vmul.f32 %v400_v10, %v1441_v4  ;;  %s473_s6 = sadd.s32 15, %s1411_s8  ;;  %v352_v21 = vstv %s1426_s2 }
  0x89   : > { %s507_s13 = sld [smem:[#allocation2 + %s506_s16]]  ;;  %s365_s27 = sadd.s32 28, %s1411_s8  ;;  %v353_v30 = vmul.f32 %v352_v21, %v1429_v1  ;;  %v357_v33 = vstv %s1431_s22 }
  0x8a   : > { %s1452_s25 = sld [smem:[#allocation2 + %s468_s12]]  ;;  %v397_v14 = vadd.f32 %v396_v9, %v392_v11  ;;  %s369_s20 = sadd.s32 29, %s1411_s8  ;;  %v358_v43 = vmul.f32 %v357_v33, %v1435_v2  ;;  %v362_v44 = vstv %s1433_s17 }
  0x8b   : > { %s1454_s0 = sld [smem:[#allocation2 + %s511_s1]]  ;;  %s374_s16 = sadd.s32 30, %s1411_s8  ;;  %v461_v34 = vstv %s1437_s15  ;;  %v354_v42 = vadd.f32 %v353_v30, %v349_v27  ;;  %v363_v60 = vmul.f32 %v362_v44, %v1441_v4 }
  0x8c   : > { %s1464_s26 = sld [smem:[#allocation2 + %s365_s27]]  ;;  %v1471_v18 = vadd.f32 %v401_v12, %v397_v14  ;;  %s379_s27 = sadd.s32 31, %s1411_s8  ;;  %v465_v36 = vstv %s1439_s9  ;;  %v462_v46 = vmul.f32 %v461_v34, %v1457_v13 }
  0x8d   : > { %v499_v19 = vstv %s498_s10  ;;  %s1473_s12 = sld [smem:[#allocation2 + %s369_s20]]  ;;  %s478_s20 = sadd.s32 16, %s1411_s8  ;;  %v466_v47 = vmul.f32 %v465_v36, %v1462_v15  ;;  %v359_v59 = vadd.f32 %v358_v43, %v354_v42 }
  0x8e   : > { %v500_v22 = vmul.f32 %v499_v19, %v1457_v13  ;;  %v503_v23 = vstv %s502_s30  ;;  %s1481_s1 = sld [smem:[#allocation2 + %s374_s16]]  ;;  %v1489_v26 = vadd.f32 1e-07, %v1471_v18  ;;  %s482_s14 = sadd.s32 17, %s1411_s8 }
  0x8f   : > { %v504_v24 = vmul.f32 %v503_v23, %v1462_v15  ;;  %v508_v25 = vstv %s507_s13  ;;  %s1485_s11 = sld [smem:[#allocation2 + %s379_s27]]  ;;  %s487_s30 = sadd.s32 18, %s1411_s8  ;;  %v467_v61 = vadd.f32 %v466_v47, %v462_v46 }
  0x90   : > { %v509_v28 = vmul.f32 %v508_v25, %v1468_v16  ;;  %s1494_s2 = sld [smem:[#allocation2 + %s478_s20]]  ;;  %934 = vrcp.f32 %v1489_v26  ;;  %v470_v48 = vstv %s1452_s25  ;;  %s406_s15 = sadd.s32 1, %s1411_s8 }
  0x91   : > { %v513_v29 = vstv %s1454_s0  ;;  %v505_v31 = vadd.f32 %v504_v24, %v500_v22  ;;  %s1499_s10 = sld [smem:[#allocation2 + %s482_s14]]  ;;  %s492_s0 = sadd.s32 19, %s1411_s8  ;;  %v471_v62 = vmul.f32 %v470_v48, %v1468_v16 }
  0x92   : > { %v514_v32 = vmul.f32 %v513_v29, %v1477_v20  ;;  %v367_v35 = vstv %s1464_s26  ;;  %s1506_s13 = sld [smem:[#allocation2 + %s487_s30]]  ;;  %s440_s17 = sadd.s32 8, %s1411_s8 }
  0x93   : > { %s1512_s16 = sld [smem:[#allocation2 + %s473_s6]]  ;;  %v510_v37 = vadd.f32 %v509_v28, %v505_v31  ;;  %v368_v38 = vmul.f32 %v367_v35, %v1424_v0  ;;  %v371_v39 = vstv %s1473_s12  ;;  %s444_s25 = sadd.s32 9, %s1411_s8  ;;  %v472_v8 = vadd.f32 %v471_v62, %v467_v61 }
  0x94   : > { %v372_v40 = vmul.f32 %v371_v39, %v1429_v1  ;;  %v376_v41 = vstv %s1481_s1  ;;  %s1520_s22 = sld [smem:[#allocation2 + %s492_s0]]  ;;  %s449_s26 = sadd.s32 10, %s1411_s8 }
  0x95   : > { %v515_v45 = vadd.f32 %v514_v32, %v510_v37  ;;  %v377_v52 = vmul.f32 %v376_v41, %v1435_v2  ;;  %v381_v54 = vstv %s1485_s11  ;;  %s1534_s9 = sld [smem:[#allocation2 + %s440_s17]]  ;;  %s454_s1 = sadd.s32 11, %s1411_s8 }
  0x96   : > { %v480_v49 = vstv %s1494_s2  ;;  %v373_v51 = vadd.f32 %v372_v40, %v368_v38  ;;  %s1538_s6 = sld [smem:[#allocation2 + %s444_s25]]  ;;  %v382_v2 = vmul.f32 %v381_v54, %v1441_v4  ;;  %s421_s2 = sadd.s32 4, %s1411_s8  ;;  %v1561_v4 = vadd.f32 %v363_v60, %v359_v59 }
  0x97   : > { %v521_v50 = vadd.f32 %v515_v45, %v1471_v18  ;;  %v484_v53 = vstv %s1499_s10  ;;  %v481_v55 = vmul.f32 %v480_v49, %v1457_v13  ;;  %s1543_s12 = sld [smem:[#allocation2 + %s449_s26]]  ;;  %s411_s14 = sadd.s32 2, %s1411_s8 }
  0x98   : > { %v485_v56 = vmul.f32 %v484_v53, %v1462_v15  ;;  %v489_v58 = vstv %s1506_s13  ;;  %v378_v1 = vadd.f32 %v377_v52, %v373_v51  ;;  %s1549_s27 = sld [smem:[#allocation2 + %s1411_s8]]  ;;  %s425_s10 = sadd.s32 5, %s1411_s8 }
  0x99   : > { %v527_v57 = vadd.f32 1e-07, %v521_v50  ;;  %v475_v0 = vstv %s1512_s16  ;;  %s1551_s11 = sld [smem:[#allocation2 + %s454_s1]]  ;;  %v490_v5 = vmul.f32 %v489_v58, %v1468_v16  ;;  %s430_s0 = sadd.s32 6, %s1411_s8 }
  0x9a   : > { %v935_v63 = vpop.eup %934  ;;  %v486_v3 = vadd.f32 %v485_v56, %v481_v55  ;;  %s1554_s20 = sld [smem:[#allocation2 + %s406_s15]]  ;;  %v494_v7 = vstv %s1520_s22  ;;  %v476_v9 = vmul.f32 %v475_v0, %v1477_v20  ;;  %v1569_v11 = vadd.f32 %v382_v2, %v378_v1  ;;  %s1578_s16 = sshll.u32 %s1395_s7, 4 }
  0x9b   : > { %936 = vrcp.f32 %v527_v57  ;;  %v534_v6 = vmul.f32 %v935_v63, %v1489_v26  ;;  %v442_v10 = vstv %s1534_s9  ;;  %s1565_s30 = sld [smem:[#allocation2 + %s421_s2]]  ;;  %v495_v21 = vmul.f32 %v494_v7, %v1477_v20  ;;  %s416_s15 = sadd.s32 3, %s1411_s8 }
  0x9c   : > { %s1567_s13 = sld [smem:[#allocation2 + %s425_s10]]  ;;  %v443_v12 = vmul.f32 %v442_v10, %v1457_v13  ;;  %v446_v14 = vstv %s1538_s6  ;;  %v491_v19 = vadd.f32 %v490_v5, %v486_v3  ;;  %s435_s9 = sadd.s32 7, %s1411_s8  ;;  %v477_v31 = vadd.f32 %v476_v9, %v472_v8 }
  0x9d   : > { %v535_v17 = vsub.f32 2.0, %v534_v6  ;;  %v447_v22 = vmul.f32 %v446_v14, %v1462_v15  ;;  %v451_v23 = vstv %s1543_s12  ;;  %s1580_s22 = sld [smem:[#allocation2 + %s411_s14]]  ;;  %s1600_s6 = scalar_lea.vmem [#allocation10], %s1578_s16 }
  0x9e   : > { %v452_v24 = vmul.f32 %v451_v23, %v1468_v16  ;;  %s1586_s17 = sld [smem:[#allocation2 + %s430_s0]]  ;;  %v496_v32 = vadd.f32 %v495_v21, %v491_v19  ;;  %v404_v35 = vstv %s1549_s27  ;;  %s598_s26 = sshll.u32 %s1600_s6, 4  ;;  %v519_v45 = vadd.f32 %v477_v31, %v1561_v4  ;;  %s1615_s26 = int_to_ptr.vmem [resolvable:$true] %s598_s26 }
  0x9f   : > { %v456_v25 = vstv %s1551_s11  ;;  %v536_v26 = vmul.f32 %v935_v63, %v535_v17  ;;  %v448_v27 = vadd.f32 %v447_v22, %v443_v12  ;;  %s1593_s25 = sld [smem:[#allocation2 + %s416_s15]]  ;;  %s561_s12 = sand.u32 1, %s1236_s24   ;;  %v405_v49 = vmul.f32 %v404_v35, %v1457_v13 }
  0xa0   : > { %v457_v28 = vmul.f32 %v456_v25, %v1477_v20  ;;  %v408_v36 = vstv %s1554_s20  ;;  %s1597_s8 = sld [smem:[#allocation2 + %s435_s9]]  ;;  %v520_v47 = vadd.f32 %v496_v32, %v1569_v11  ;;  %s336_s1 = scalar_lea.vmem [#allocation12], %s1578_s16 }
  0xa1   : > { %v547_v29 = vmul.f32 %v536_v26, %v1561_v4  ;;  %v551_v30 = vmul.f32 %v536_v26, %v1569_v11  ;;  %v453_v33 = vadd.f32 %v452_v24, %v448_v27  ;;  %v423_v41 = vstv %s1565_s30  ;;  %s1613_s27 = sshll.u32 %s1155_s21, 8  ;;  %s615_s24 = sshll.u32 %s336_s1, 4  ;;  %s1638_s24 = int_to_ptr.vmem [resolvable:$true] %s615_s24 }
  0xa2   : > { %v427_v42 = vstv %s1567_s13  ;;  %v409_v50 = vmul.f32 %v408_v36, %v1462_v15  ;;  %v424_v51 = vmul.f32 %v423_v41, %v1457_v13  ;;  %s1626_s20 = scalar_lea.hbm %s1776_s4, %s1613_s27  ;;  %s1644_s10 = scalar_lea.hbm %s1777_s5, %s1613_s27 }
  0xa3   : > { %v548_v37 = vmul.f32 0.13333334, %v547_v29  ;;  %v552_v38 = vmul.f32 0.13333334, %v551_v30  ;;  %v458_v40 = vadd.f32 %v457_v28, %v453_v33  ;;  %v428_v52 = vmul.f32 %v427_v42, %v1462_v15  ;;  %s1650_s30 = scalar_lea.sflag [#allocation11], %s561_s12  ;;  %s1013_s13 = scalar_lea.vmem %s1615_s26, 256 }
  0xa4   : > { %v432_v13 = vstv %s1586_s17  ;;  %v1628_v56 = vadd.f32 %v409_v50, %v405_v49  ;;  %p1014_p13 = scmp.ne.s32.totalorder %s1615_s26, %s1013_s13  ;;  %s1170_s0 = smov [#allocation10]  }
  0xa5   : > { %v937_v34 = vpop.eup %936  ;;  %v823_v43 = vadd.f32 -1.0, %v548_v37  ;;  %v824_v44 = vadd.f32 -1.0, %v552_v38  ;;  %v518_v48 = vadd.f32 %v458_v40, %v1471_v18  ;;  %v413_v18 = vstv %s1580_s22  ;;  %s1017_s22 = sshll.u32 %s1170_s0, 4  ;;  %s1018_s22 = int_to_ptr.vmem [resolvable:$false] %s1017_s22 }
  0xa6   : > { %v529_v39 = vmul.f32 %v937_v34, %v527_v57  ;;  %v1631_v57 = vmul.f32 %v413_v18, %v1468_v16  ;;  %v1633_v58 = vadd.f32 %v428_v52, %v424_v51  ;;  %v1636_v59 = vmul.f32 %v432_v13, %v1468_v16  ;;  %p1015_p2 = pnand %p1014_p13, %p1806_p12  ;;  %s1019_s15 = scalar_lea.vmem %s1018_s22, 512 }
  0xa7   : > { %550 = vst [vmem:[%s336_s1] sm:$0xff] %v823_v43  ;;  %825 = vst [vmem:[%s336_s1 + $0x8] sm:$0xff] %v824_v44  ;;  %v1618_v54 = vadd.f32 1e-07, %v518_v48  ;;  %v418_v60 = vstv %s1593_s25  ;;  %v437_v61 = vstv %s1597_s8  ;;  %p1020_p11 = scmp.lt.s32.totalorder %s1615_s26, %s1018_s22  ;;  %p1021_p5 = scmp.lt.s32.totalorder %s1019_s15, %s1013_s13 }
  0xa8   : > { %v530_v46 = vsub.f32 2.0, %v529_v39  ;;  %p1016_p10 = pneg %p1015_p2 }
  0xa9   : > { %938 = vrcp.f32 %v1618_v54  ;;  %p1022_p3 = por %p1021_p5, %p1020_p11 }
  0xaa   : > { %v531_v53 = vmul.f32 %v937_v34, %v530_v46 }
  0xab   : > { %p1023_p7 = pnand %p1022_p3, %p1016_p10 }
  0xac   : > { %v542_v15 = vmul.f32 %v531_v53, %v519_v45  ;;  %v544_v55 = vmul.f32 %v531_v53, %v520_v47 }
  0xae   : > { %543 = vst [vmem:[%s1600_s6] sm:$0xff] %v542_v15  ;;  %822 = vst [vmem:[%s1600_s6 + $0x8] sm:$0xff] %v544_v55 }
  0xaf   : > { %1026 = shalt.err (!%p1023_p7)
}
  0xb0   : > { %s1027_s17 = scalar_lea.hbm %s1626_s20, 256  ;;  %s1031_s8 = scalar_lea.hbm %s1776_s4, 512 }
  0xb1   : > { %p1028_p6 = scmp.ne.s32.totalorder %s1626_s20, %s1027_s17  ;;  %p1032_p0 = scmp.lt.u32.totalorder %s1626_s20, %s1776_s4 }
  0xb2   : > { %p1033_p8 = scmp.lt.u32.totalorder %s1031_s8, %s1027_s17  ;;  %p1035_p13 = scmp.lt.u32.totalorder %s1027_s17, %s1626_s20 }
  0xb3   : > { %p1029_p1 = pnand %p1028_p6, %p1806_p12 }
  0xb4   : > { %p1034_p4 = por %p1033_p8, %p1032_p0 }
  0xb5   : > { %p1030_p9 = pneg %p1029_p1 }
  0xb6   : > { %p1036_p2 = por %p1035_p13, %p1034_p4 }
  0xb8   : > { %p1037_p10 = pnand %p1036_p2, %p1030_p9 }
  0xba   : > { %1040 = shalt.err (!%p1037_p10)
}
  0xbb   : > { %s1171_s1 = smov 128   ;;  %s1172_s21 = smov 8  }
  0xbc   : > { %851 = dma.vmem_to_hbm [thread:$0]  (%p1806_p12), %s1615_s26, 256, %s1626_s20, %s1650_s30, %s1171_s1, %s1171_s1, %s1172_s21  }
  0xbd   : > { %s1041_s11 = scalar_lea.vmem %s1638_s24, 256  ;;  %s1173_s2 = smov [#allocation12]  }
  0xbe   : > { %p1042_p11 = scmp.ne.s32.totalorder %s1638_s24, %s1041_s11  ;;  %s1045_s14 = sshll.u32 %s1173_s2, 4  ;;  %s1046_s14 = int_to_ptr.vmem [resolvable:$false] %s1045_s14 }
  0xbf   : > { %s1047_s13 = scalar_lea.vmem %s1046_s14, 512  ;;  %p1048_p7 = scmp.lt.s32.totalorder %s1638_s24, %s1046_s14 }
  0xc0   : > { %p1043_p5 = pnand %p1042_p11, %p1806_p12  ;;  %p1049_p6 = scmp.lt.s32.totalorder %s1047_s13, %s1041_s11 }
  0xc2   : > { %p1044_p3 = pneg %p1043_p5  ;;  %p1050_p1 = por %p1049_p6, %p1048_p7 }
  0xc4   : > { %p1051_p9 = pnand %p1050_p1, %p1044_p3 }
  0xc6   : > { %1054 = shalt.err (!%p1051_p9)
}
  0xc7   : > { %s1055_s26 = scalar_lea.hbm %s1644_s10, 256  ;;  %s1059_s22 = scalar_lea.hbm %s1777_s5, 512 }
  0xc8   : > { %p1056_p0 = scmp.ne.s32.totalorder %s1644_s10, %s1055_s26  ;;  %p1060_p13 = scmp.lt.u32.totalorder %s1644_s10, %s1777_s5 }
  0xc9   : > { %p1061_p2 = scmp.lt.u32.totalorder %s1059_s22, %s1055_s26  ;;  %p1063_p11 = scmp.lt.u32.totalorder %s1055_s26, %s1644_s10 }
  0xca   : > { %p1057_p8 = pnand %p1056_p0, %p1806_p12 }
  0xcb   : > { %p1062_p10 = por %p1061_p2, %p1060_p13 }
  0xcc   : > { %p1058_p4 = pneg %p1057_p8 }
  0xcd   : > { %p1064_p5 = por %p1063_p11, %p1062_p10 }
  0xcf   : > { %p1065_p3 = pnand %p1064_p5, %p1058_p4 }
  0xd1   : > { %1068 = shalt.err (!%p1065_p3)
}
  0xd2   : > { %852 = dma.vmem_to_hbm [thread:$0]  (%p1806_p12), %s1638_s24, 256, %s1644_s10, %s1650_s30, %s1171_s1, %s1171_s1, %s1172_s21   ;;  %v415_v16 = vadd.f32 %v1631_v57, %v1628_v56  ;;  %v419_v62 = vmul.f32 %v418_v60, %v1477_v20  ;;  %v434_v63 = vadd.f32 %v1636_v59, %v1633_v58  ;;  %v438_v0 = vmul.f32 %v437_v61, %v1477_v20  ;;  %v939_v3 = vpop.eup %938 }
  0xd3   : > { %v524_v5 = vmul.f32 %v939_v3, %v1618_v54  ;;  %s322_s24 = scalar_lea.vmem [#allocation9], %s1578_s16  ;;  %s1718_s25 = scalar_lea.hbm %s1775_s3, %s1613_s27 }
  0xd4   : > { %v420_v1 = vadd.f32 %v419_v62, %v415_v16  ;;  %v439_v2 = vadd.f32 %v438_v0, %v434_v63  ;;  %s581_s10 = sshll.u32 %s322_s24, 4  ;;  %s557_s8 = scalar_lea.sflag [#allocation4], %s1395_s7  ;;  %s1712_s10 = int_to_ptr.vmem [resolvable:$true] %s581_s10 }
  0xd5   : > { %v525_v7 = vsub.f32 2.0, %v524_v5  ;;  %s1069_s16 = scalar_lea.vmem %s1712_s10, 256  ;;  %s1174_s6 = smov [#allocation9]  }
  0xd6   : > { %v516_v6 = vadd.f32 %v420_v1, %v1561_v4  ;;  %v517_v8 = vadd.f32 %v439_v2, %v1569_v11  ;;  %p1070_p7 = scmp.ne.s32.totalorder %s1712_s10, %s1069_s16  ;;  %s1073_s12 = sshll.u32 %s1174_s6, 4  ;;  %s1074_s12 = int_to_ptr.vmem [resolvable:$false] %s1073_s12 }
  0xd7   : > { %v526_v9 = vmul.f32 %v939_v3, %v525_v7  ;;  %s1075_s11 = scalar_lea.vmem %s1074_s12, 512  ;;  %p1076_p9 = scmp.lt.s32.totalorder %s1712_s10, %s1074_s12 }
  0xd8   : > { %p1071_p6 = pnand %p1070_p7, %p1806_p12  ;;  %p1077_p0 = scmp.lt.s32.totalorder %s1075_s11, %s1069_s16 }
  0xd9   : > { %v537_v20 = vmul.f32 %v526_v9, %v516_v6  ;;  %v539_v10 = vmul.f32 %v526_v9, %v517_v8 }
  0xda   : > { %p1072_p1 = pneg %p1071_p6  ;;  %p1078_p8 = por %p1077_p0, %p1076_p9 }
  0xdb   : > { %538 = vst [vmem:[%s322_s24] sm:$0xff] %v537_v20  ;;  %821 = vst [vmem:[%s322_s24 + $0x8] sm:$0xff] %v539_v10 }
  0xdc   : > { %p1079_p4 = pnand %p1078_p8, %p1072_p1 }
  0xde   : > { %1082 = shalt.err (!%p1079_p4)
}
  0xdf   : > { %s1083_s27 = scalar_lea.hbm %s1718_s25, 256  ;;  %s1087_s13 = scalar_lea.hbm %s1775_s3, 512 }
  0xe0   : > { %p1084_p13 = scmp.ne.s32.totalorder %s1718_s25, %s1083_s27  ;;  %p1088_p11 = scmp.lt.u32.totalorder %s1718_s25, %s1775_s3 }
  0xe1   : > { %p1089_p5 = scmp.lt.u32.totalorder %s1087_s13, %s1083_s27  ;;  %p1091_p7 = scmp.lt.u32.totalorder %s1083_s27, %s1718_s25 }
  0xe2   : > { %p1085_p2 = pnand %p1084_p13, %p1806_p12 }
  0xe3   : > { %p1090_p3 = por %p1089_p5, %p1088_p11 }
  0xe4   : > { %p1086_p10 = pneg %p1085_p2 }
  0xe5   : > { %p1092_p6 = por %p1091_p7, %p1090_p3 }
  0xe7   : > { %p1093_p1 = pnand %p1092_p6, %p1086_p10 }
  0xe9   : > { %1096 = shalt.err (!%p1093_p1)
}
  0xea   : > { %850 = dma.vmem_to_hbm [thread:$0]  (%p1806_p12), %s1712_s10, 256, %s1718_s25, %s557_s8, %s1171_s1, %s1171_s1, %s1172_s21  }
  0xeb PF: > { %s630_s0 = sand.u32 1, %s1143_s18   ;;  %p1807_p9 = scmp.ne.s32.totalorder %s1793_s29, 0 }
  0xec   : > { %p1808_p0 = scmp.ge.s32.totalorder %s1163_s23, 2  ;;  %s631_s22 = scalar_lea.sflag [#allocation4], %s630_s0 }
  0xee   : > { %p868_p8 = pnand %p1808_p0, %p1807_p9 }
  0xf0   : > { %1134 = dma.done.wait (!%p868_p8), %s631_s22, 256  }
  0xf1   : > { %1136 = vsyncadd (!%p868_p8), %s631_s22, 4294967040  ;;  %s1809_s28 = sadd.s32 4294967294, %s1163_s23  }
  0xf2   : > { %s639_s15 = sand.u32 1, %s1809_s28  }
  0xf3   : > { %s640_s17 = scalar_lea.sflag [#allocation11], %s639_s15 }
  0xf4   : > { %1138 = dma.done.wait (!%p868_p8), %s640_s17, 512  }
  0xf5   : > { %1140 = vsyncadd (!%p868_p8), %s640_s17, 4294966784  ;;  %s29_s23 = sadd.s32 1, %s1163_s23   ;;  %s1810_s7 = sld [smem:[#allocation18_spill]] }
  0xf6   : > { %p26_p12 = scmp.ge.s32.totalorder %s29_s23, 4   ;;  %s1811_s20 = sld [smem:[#allocation21_spill]] }
  0xf7   : > { %s1812_s21 = sld [smem:[#allocation19_spill]]  ;;  %s1813_s22 = sld [smem:[#allocation20_spill]] }
  0xf8   : > { %s1814_s18 = smov %s1147_s19  ;;  %28 = sbr.rel (!%p26_p12) target bundleno = 15 (0xf), region = 130 }
  0xfb   : > { %s1815_s19 = smov %s1810_s7 }
  0xff   :  { %654 = vsyncpa [#allocation3], 1 }
 0x100   :  { %656 = vsyncpa [#allocation3 + $0x1], 1 }
 0x101   :  { %657 = vsyncpa [#allocation8], 1 }
 0x102   :  { %659 = vsyncpa [#allocation8 + $0x1], 1 }
 0x103   :  { %660 = vsyncpa [#allocation4], 1 }
 0x104   :  { %662 = vsyncpa [#allocation4 + $0x1], 1 }
 0x105   :  { %663 = vsyncpa [#allocation11], 1 }
 0x106   :  { %665 = vsyncpa [#allocation11 + $0x1], 1 }
 0x107   :  { %666 = vsyncpa [#allocation5], 1 }
 0x108   :  { %668 = vsyncpa [#allocation5 + $0x1], 1 }

</bundles_post_ra>
